<compile_context>
chip_gen: v7x
topology: tpu7x:2x2x1
jax: 0.10.0
libtpu: 0.0.40
codegen_flags: <defaults>
</compile_context>

<pallas_src>
import math
import numpy as np
import jax
import jax.numpy as jnp
from jax.experimental import pallas as pl
from jax.experimental.pallas import tpu as pltpu

_PHASE = (2.0 * math.pi - 1e-9) * 0.5     # be == zeros  ->  constant phase in compute_qstate
_CPH = math.cos(_PHASE)
_SPH = math.sin(_PHASE)


# ----------------------------- parameter glue (plain JAX) -----------------------------
def zyz_matrix_entries(alpha, beta, gamma, delta):
    """ZYZ.forward's reparameterized U, returned as (8, n) real entries:
       [e00r, e00i, e01r, e01i, e10r, e10i, e11r, e11i]."""
    t = lambda x: jnp.tanh(x) * (4.0 * jnp.pi) / 2.0 + (4.0 * jnp.pi) / 2.0
    a, b, g, d = t(alpha), t(beta), t(gamma), t(delta)
    cg, sg = jnp.cos(g / 2.0), jnp.sin(g / 2.0)
    p00 = a - b / 2.0 - d / 2.0
    p01 = a - b / 2.0 + d / 2.0
    p10 = a + b / 2.0 - d / 2.0
    p11 = a + b / 2.0 + d / 2.0
    return jnp.stack([
        jnp.cos(p00) * cg,  jnp.sin(p00) * cg,
        -jnp.cos(p01) * sg, -jnp.sin(p01) * sg,
        jnp.cos(p10) * sg,  jnp.sin(p10) * sg,
        jnp.cos(p11) * cg,  jnp.sin(p11) * cg,
    ], axis=0).astype(jnp.float32)


def init_u_params(key, n_qubits):
    """Deterministic ZYZ params for [u_a, u_b, cu_ab] -> (3, 8, n_qubits)."""
    keys = jax.random.split(key, 12)
    mats = []
    for j in range(3):
        abgd = [jax.random.normal(keys[4 * j + t], (n_qubits,), dtype=jnp.float32)
                for t in range(4)]
        mats.append(zyz_matrix_entries(*abgd))
    return jnp.stack(mats, axis=0)


# ----------------------------------- Pallas kernel -----------------------------------
def _qi_head_kernel(hidden_ref, mask_ref, u_ref, out_ref, num_acc, den_acc):
    # hidden_ref: (TB, TS, H)  producer dtype (f32 or bf16), lane-dense in H
    # mask_ref:   (TB, TS)     f32 (unit dim squeezed by BlockSpec)
    # u_ref:      (3, 8, Hh)   f32
    # out_ref:    (TB, H)      f32 lane-dense: [:, :Hh] = |0> amp, [:, Hh:] = |1> amp
    # num_acc:    (TB, H)      f32 scratch   den_acc: (TB, 1) f32 scratch
    k = pl.program_id(1)

    @pl.when(k == 0)
    def _():
        num_acc[...] = jnp.zeros_like(num_acc)
        den_acc[...] = jnp.zeros_like(den_acc)

    # --- masked-sum accumulation for this sequence chunk ---
    m = mask_ref[...]                                        # (TB, TS) f32, values are 0/1
    h = hidden_ref[...]                                      # (TB, TS, H)
    prod = h * m[:, :, None].astype(h.dtype)                 # multiply in the input dtype
    num_acc[...] += jnp.sum(prod.astype(jnp.float32), axis=1)
    den_acc[...] += jnp.sum(m, axis=1, keepdims=True)

    # --- qi head: only on the last sequence chunk of this row block ---
    @pl.when(k == pl.num_programs(1) - 1)
    def _():
        Hh = u_ref.shape[-1]
        den = jnp.maximum(den_acc[...], 1e-9)                # torch.clamp(min=1e-9)
        inv_den = pl.reciprocal(den, approx=True)            # EUP slot (otherwise idle)
        inv_den = inv_den * (2.0 - den * inv_den)            # one NR step: full f32 accuracy
        pooled = num_acc[...] * inv_den                       # (TB, H)

        # qubit state preparation (compute_qstate)
        ae = jnp.tanh(pooled)
        half = ae * (jnp.pi * 0.25) + (jnp.pi * 0.25)        # mags / 2
        amp0 = jnp.cos(half)                                 # |0> amplitude (imag = 0)
        s = jnp.sin(half)
        amp1_re = s * _CPH                                   # |1> amplitude = sin * e^{i phase}
        amp1_im = s * _SPH

        # a = first-half qubits (targets), b = second-half (controls); static lane slice
        # (Hh = 384 in production = 3*128 -> pure vreg selection).
        a0_re, a1_re, a1_im = amp0[:, :Hh], amp1_re[:, :Hh], amp1_im[:, :Hh]
        b0_re, b1_re, b1_im = amp0[:, Hh:], amp1_re[:, Hh:], amp1_im[:, Hh:]

        U = u_ref[...]                                       # (3, 8, Hh)

        def apply_u(idx, q0_re, q0_im, q1_re, q1_im):
            u00r, u00i = U[idx, 0:1, :], U[idx, 1:2, :]
            u01r, u01i = U[idx, 2:3, :], U[idx, 3:4, :]
            u10r, u10i = U[idx, 4:5, :], U[idx, 5:6, :]
            u11r, u11i = U[idx, 6:7, :], U[idx, 7:8, :]
            o0_re = u00r * q0_re - u00i * q0_im + u01r * q1_re - u01i * q1_im
            o0_im = u00r * q0_im + u00i * q0_re + u01r * q1_im + u01i * q1_re
            o1_re = u10r * q0_re - u10i * q0_im + u11r * q1_re - u11i * q1_im
            o1_im = u10r * q0_im + u10i * q0_re + u11r * q1_im + u11i * q1_re
            return o0_re, o0_im, o1_re, o1_im

        za = jnp.zeros_like(a0_re)
        ua0_re, ua0_im, ua1_re, ua1_im = apply_u(0, a0_re, za, a1_re, a1_im)
        ub0_re, ub0_im, ub1_re, ub1_im = apply_u(1, b0_re, za, b1_re, b1_im)

        def cmul(xr, xi, yr, yi):
            return xr * yr - xi * yi, xr * yi + xi * yr

        # tensor product  ba[k, i*2+j] = ub_out[i] * ua_out[j]
        v0_re, v0_im = cmul(ub0_re, ub0_im, ua0_re, ua0_im)
        v1_re, v1_im = cmul(ub0_re, ub0_im, ua1_re, ua1_im)
        v2_re, v2_im = cmul(ub1_re, ub1_im, ua0_re, ua0_im)
        v3_re, v3_im = cmul(ub1_re, ub1_im, ua1_re, ua1_im)

        # controlled-U: identity on (v0, v1), cu_ab on (v2, v3)
        c00r, c00i = U[2, 0:1, :], U[2, 1:2, :]
        c01r, c01i = U[2, 2:3, :], U[2, 3:4, :]
        c10r, c10i = U[2, 4:5, :], U[2, 5:6, :]
        c11r, c11i = U[2, 6:7, :], U[2, 7:8, :]
        w0_re, w0_im = v0_re, v0_im
        w1_re, w1_im = v1_re, v1_im
        w2_re = c00r * v2_re - c00i * v2_im + c01r * v3_re - c01i * v3_im
        w2_im = c00r * v2_im + c00i * v2_re + c01r * v3_im + c01i * v3_re
        w3_re = c10r * v2_re - c10i * v2_im + c11r * v3_re - c11i * v3_im
        w3_im = c10r * v2_im + c10i * v2_re + c11r * v3_im + c11i * v3_re

        # partial trace over the control qubit; the imaginary part is exactly 0, so only
        # the real amplitudes are stored (zeros are rebuilt in the wrapper).
        q0_new = jnp.sqrt(w0_re * w0_re + w0_im * w0_im + w2_re * w2_re + w2_im * w2_im)
        q1_new = jnp.sqrt(w1_re * w1_re + w1_im * w1_im + w3_re * w3_re + w3_im * w3_im)
        out_ref[...] = jnp.concatenate([q0_new, q1_new], axis=-1)   # (TB, H) lane-dense


# ----------------------------------- wrapper (glue) -----------------------------------
def _pick_tiles(BN, S, H, itemsize):
    """Pick (rows-per-step, seq-chunk).  ts must be a 128-multiple (mask lane constraint)
    dividing S, else the whole sequence.  tb is the largest divisor of B*N whose hidden
    block stays ~<= 8 MiB, so the double-buffered pipeline fits comfortably inside v7x's
    64 MiB VMEM (and easily inside v5e/v6e's 128 MiB).  Both are exact divisors -> no
    padding and no extra HBM pass."""
    ts = S
    if S % 128 == 0:
        for cand in (512, 384, 256, 128):
            if S % cand == 0:
                ts = cand
                break
    cap = max(1, (8 << 20) // max(1, ts * H * itemsize))
    tb = 1
    for d in range(min(cap, BN), 0, -1):
        if BN % d == 0:
            tb = d
            break
    return tb, ts


def qi_bert_embedder_forward(hidden, mask, u_params, tb=None, ts=None, vmem_limit_bytes=None):
    """hidden: (B, N, S, H) -- BERT last_hidden_state stand-in per sentence (f32 or bf16)
       mask:   (B, N, S)    -- attention masks
       u_params: (3, 8, H//2) float32 -- [u_a, u_b, cu_ab] ZYZ matrix entries
       returns (B, N, H//2, 2, 2) float32  (== torch.view_as_real of updated qubits)"""
    B, N, S, H = hidden.shape
    Hh = H // 2
    BN = B * N

    # Free layout plumbing only: merge leading dims (trailing dims untouched -> no relayout)
    # and keep hidden in its producer dtype (no standalone cast pass, no jnp.pad).
    hidden_f = hidden.reshape(BN, S, H)
    # Mask as (BN, 1, S): S lane-dense; the unit dim is squeezed in the BlockSpec so the
    # row-tile does not have to be a multiple of 8.
    mask_f = mask.reshape(BN, 1, S).astype(jnp.float32)

    auto_tb, auto_ts = _pick_tiles(BN, S, H, hidden_f.dtype.itemsize)
    if tb is None:
        tb = auto_tb
    if ts is None:
        ts = auto_ts
    tb = int(min(tb, BN))
    ts = int(min(ts, S))
    assert BN % tb == 0, "tb must divide B*N (exact grid, no padding pass)"
    assert S % ts == 0, "ts must divide S"

    n_blocks = BN // tb
    n_chunks = S // ts
    if vmem_limit_bytes is None:
        vmem_limit_bytes = 48 * 1024 * 1024   # below v7x's 64 MiB physical; fine on v5e/v6e

    out = pl.pallas_call(
        _qi_head_kernel,
        out_shape=jax.ShapeDtypeStruct((BN, 1, H), jnp.float32),
        grid=(n_blocks, n_chunks),
        in_specs=[
            pl.BlockSpec((tb, ts, H), lambda i, k: (i, k, 0)),     # hidden, lane-dense in H
            pl.BlockSpec((tb, None, ts), lambda i, k: (i, 0, k)),  # mask, lane-dense in S
            pl.BlockSpec((3, 8, Hh), lambda i, k: (0, 0, 0)),      # U params, resident
        ],
        out_specs=pl.BlockSpec((tb, None, H), lambda i, k: (i, 0, 0)),
        scratch_shapes=[pltpu.VMEM((tb, H), jnp.float32),          # masked-sum accumulator
                        pltpu.VMEM((tb, 1), jnp.float32)],         # mask-count accumulator
        compiler_params=pltpu.CompilerParams(
            dimension_semantics=("parallel", "arbitrary"),
            vmem_limit_bytes=vmem_limit_bytes),
    )(hidden_f, mask_f, u_params.astype(jnp.float32))

    out = out.reshape(BN, H)                                       # (BN, H) real amplitudes
    real = jnp.stack([out[:, :Hh], out[:, Hh:]], axis=-1).reshape(B, N, Hh, 2)
    # post-trace imaginary part is exactly zero -> rebuild view_as_real layout here
    return jnp.stack([real, jnp.zeros_like(real)], axis=-1)        # (B, N, Hh, 2, 2)


# ------------------------------- NumPy reference check -------------------------------
def reference_forward(hidden, mask, u_params):
    hidden = np.asarray(hidden, dtype=np.float64)
    mask = np.asarray(mask, dtype=np.float64)
    up = np.asarray(u_params, dtype=np.float64)
    B, N, S, H = hidden.shape
    Hh = H // 2
    m = mask[..., None]
    pooled = (hidden * m).sum(axis=2) / np.maximum(m.sum(axis=2), 1e-9)
    ae = np.tanh(pooled)
    mags = ae * np.pi / 2 + np.pi / 2
    a = np.cos(mags / 2).astype(np.complex128)
    b = np.sin(mags / 2) * (_CPH + 1j * _SPH)
    qubits = np.stack([a, b], axis=-1)                      # (B,N,H,2) complex

    def to_U(e):                                            # (8,n) -> (n,2,2) complex
        return np.stack([np.stack([e[0] + 1j * e[1], e[2] + 1j * e[3]], axis=-1),
                         np.stack([e[4] + 1j * e[5], e[6] + 1j * e[7]], axis=-1)], axis=-2)

    Ua, Ub, Ucu = to_U(up[0]), to_U(up[1]), to_U(up[2])
    qa, qb = qubits[:, :, :Hh, :], qubits[:, :, Hh:, :]
    ua_out = np.einsum('kij,bnkj->bnki', Ua, qa)
    ub_out = np.einsum('kij,bnkj->bnki', Ub, qb)
    ba = np.einsum('bnki,bnkj->bnkij', ub_out, ua_out).reshape(B, N, Hh, 4)
    CU = np.zeros((Hh, 4, 4), dtype=np.complex128)
    CU[:, 0, 0] = 1.0
    CU[:, 1, 1] = 1.0
    CU[:, 2:, 2:] = Ucu
    ba = np.einsum('kij,bnkj->bnki', CU, ba)
    new = np.sqrt(np.conj(ba[..., 0:2]) * ba[..., 0:2] + np.conj(ba[..., 2:]) * ba[..., 2:])
    return np.stack([np.real(new), np.imag(new)], axis=-1)  # (B,N,Hh,2,2)


if __name__ == "__main__":
    key = jax.random.PRNGKey(0)
    k_h, k_m, k_p = jax.random.split(key, 3)

    # Case 1: tiny shapes consistent with the module (single row block, single seq chunk)
    B, N, S, H = 2, 3, 8, 32
    hidden = jax.random.normal(k_h, (B, N, S, H), dtype=jnp.float32)
    lens = (jnp.arange(B * N) % (S - 2)) + 2
    mask = (jnp.arange(S)[None, :] < lens[:, None]).astype(jnp.float32).reshape(B, N, S)
    u_params = init_u_params(k_p, H // 2)                   # (3, 8, Hh)

    out = jax.block_until_ready(qi_bert_embedder_forward(hidden, mask, u_params))
    ref = reference_forward(hidden, mask, u_params)
    np.testing.assert_allclose(np.asarray(out), ref, rtol=2e-4, atol=1e-5)

    # Case 2: exercise the multi-row-block + multi-seq-chunk accumulator path
    B2, N2, S2, H2 = 2, 2, 256, 64
    k_h2, k_p2 = jax.random.split(k_m, 2)
    hidden2 = jax.random.normal(k_h2, (B2, N2, S2, H2), dtype=jnp.float32)
    lens2 = (jnp.arange(B2 * N2) * 37 % (S2 - 5)) + 3
    mask2 = (jnp.arange(S2)[None, :] < lens2[:, None]).astype(jnp.float32).reshape(B2, N2, S2)
    u_params2 = init_u_params(k_p2, H2 // 2)
    out2 = jax.block_until_ready(
        qi_bert_embedder_forward(hidden2, mask2, u_params2, tb=2, ts=128))
    ref2 = reference_forward(hidden2, mask2, u_params2)
    np.testing.assert_allclose(np.asarray(out2), ref2, rtol=2e-4, atol=1e-5)

    print("KERNEL_OK")
</pallas_src>

<mosaic_0001>
module attributes {stable_mosaic.version = 11 : i64} {
  func.func @_qi_head_kernel(%arg0: i32, %arg1: i32, %arg2: memref<6x8x32xf32, #tpu.memory_space<vmem>>, %arg3: memref<6x1x8xf32, #tpu.memory_space<vmem>>, %arg4: memref<3x8x16xf32, #tpu.memory_space<vmem>>, %arg5: memref<6x1x32xf32, #tpu.memory_space<vmem>>, %arg6: memref<6x32xf32, #tpu.memory_space<vmem>>, %arg7: memref<6x1xf32, #tpu.memory_space<vmem>>) attributes {dimension_semantics = [#tpu.dimension_semantics<parallel>, #tpu.dimension_semantics<arbitrary>], iteration_bounds = array<i64: 1, 1>, scalar_prefetch = 0 : i64, scratch_operands = 2 : i64, tpu.core_type = #tpu.core_type<tc>, window_params = [{transform_indices = @transform_0, window_bounds = array<i64: 6, 8, 32>}, {transform_indices = @transform_1, window_bounds = array<i64: 6, 1, 8>}, {pipeline_mode = #tpu.pipeline_mode<synchronous>, transform_indices = @transform_2, window_bounds = array<i64: 3, 8, 16>}, {transform_indices = @transform_3, window_bounds = array<i64: 6, 1, 32>}]} {
    %c0_i32 = arith.constant 0 : i32
    %0 = arith.cmpi eq, %arg1, %c0_i32 : i32
    %1 = arith.extui %0 : i1 to i32
    %c0_i32_0 = arith.constant 0 : i32
    %2 = arith.cmpi ne, %1, %c0_i32_0 : i32
    scf.if %2 {
      %cst_17 = arith.constant 0.000000e+00 : f32
      %21 = vector.broadcast %cst_17 : f32 to vector<6x32xf32>
      %c0_18 = arith.constant 0 : index
      %c0_19 = arith.constant 0 : index
      %22 = vector.load %arg6[%c0_18, %c0_19] : memref<6x32xf32, #tpu.memory_space<vmem>>, vector<6x32xf32>
      tpu.vector_store %arg6[%c0_18, %c0_19], %21 {strides = array<i32>} : memref<6x32xf32, #tpu.memory_space<vmem>>, vector<6x32xf32>,
      %cst_20 = arith.constant 0.000000e+00 : f32
      %23 = vector.broadcast %cst_20 : f32 to vector<6x1xf32>
      %c0_21 = arith.constant 0 : index
      %c0_22 = arith.constant 0 : index
      %24 = vector.load %arg7[%c0_21, %c0_22] : memref<6x1xf32, #tpu.memory_space<vmem>>, vector<6x1xf32>
      tpu.vector_store %arg7[%c0_21, %c0_22], %23 {strides = array<i32>} : memref<6x1xf32, #tpu.memory_space<vmem>>, vector<6x1xf32>,
    } else {
    }
    %c0 = arith.constant 0 : index
    %c0_1 = arith.constant 0 : index
    %c0_2 = arith.constant 0 : index
    %3 = vector.load %arg3[%c0, %c0_1, %c0_2] : memref<6x1x8xf32, #tpu.memory_space<vmem>>, vector<6x1x8xf32>
    %4 = vector.shape_cast %3 : vector<6x1x8xf32> to vector<6x8xf32>
    %c0_3 = arith.constant 0 : index
    %c0_4 = arith.constant 0 : index
    %c0_5 = arith.constant 0 : index
    %5 = vector.load %arg2[%c0_3, %c0_4, %c0_5] : memref<6x8x32xf32, #tpu.memory_space<vmem>>, vector<6x8x32xf32>
    %6 = vector.shape_cast %4 : vector<6x8xf32> to vector<6x8x1xf32>
    %7 = vector.broadcast %6 : vector<6x8x1xf32> to vector<6x8x32xf32>
    %8 = arith.mulf %5, %7 : vector<6x8x32xf32>
    %c0_6 = arith.constant 0 : index
    %c0_7 = arith.constant 0 : index
    %9 = vector.load %arg6[%c0_6, %c0_7] : memref<6x32xf32, #tpu.memory_space<vmem>>, vector<6x32xf32>
    %cst = arith.constant dense<0.000000e+00> : vector<6x32xf32>
    %10 = vector.multi_reduction <add>, %8, %cst [1] : vector<6x8x32xf32> to vector<6x32xf32>
    %11 = arith.addf %9, %10 : vector<6x32xf32>
    %c0_8 = arith.constant 0 : index
    %c0_9 = arith.constant 0 : index
    %12 = vector.load %arg6[%c0_8, %c0_9] : memref<6x32xf32, #tpu.memory_space<vmem>>, vector<6x32xf32>
    tpu.vector_store %arg6[%c0_8, %c0_9], %11 {strides = array<i32>} : memref<6x32xf32, #tpu.memory_space<vmem>>, vector<6x32xf32>,
    %c0_10 = arith.constant 0 : index
    %c0_11 = arith.constant 0 : index
    %13 = vector.load %arg7[%c0_10, %c0_11] : memref<6x1xf32, #tpu.memory_space<vmem>>, vector<6x1xf32>
    %cst_12 = arith.constant dense<0.000000e+00> : vector<6xf32>
    %14 = vector.multi_reduction <add>, %4, %cst_12 [1] : vector<6x8xf32> to vector<6xf32>
    %15 = vector.shape_cast %14 : vector<6xf32> to vector<6x1xf32>
    %16 = arith.addf %13, %15 : vector<6x1xf32>
    %c0_13 = arith.constant 0 : index
    %c0_14 = arith.constant 0 : index
    %17 = vector.load %arg7[%c0_13, %c0_14] : memref<6x1xf32, #tpu.memory_space<vmem>>, vector<6x1xf32>
    tpu.vector_store %arg7[%c0_13, %c0_14], %16 {strides = array<i32>} : memref<6x1xf32, #tpu.memory_space<vmem>>, vector<6x1xf32>,
    %c0_i32_15 = arith.constant 0 : i32
    %18 = arith.cmpi eq, %arg1, %c0_i32_15 : i32
    %19 = arith.extui %18 : i1 to i32
    %c0_i32_16 = arith.constant 0 : i32
    %20 = arith.cmpi ne, %19, %c0_i32_16 : i32
    scf.if %20 {
      %c0_17 = arith.constant 0 : index
      %c0_18 = arith.constant 0 : index
      %21 = vector.load %arg7[%c0_17, %c0_18] : memref<6x1xf32, #tpu.memory_space<vmem>>, vector<6x1xf32>
      %cst_19 = arith.constant 9.99999971E-10 : f32
      %22 = vector.broadcast %cst_19 : f32 to vector<6x1xf32>
      %23 = arith.maximumf %21, %22 : vector<6x1xf32>
      %24 = tpu.reciprocal %23 {approx = true} : vector<6x1xf32> -> vector<6x1xf32>
      %25 = arith.mulf %23, %24 : vector<6x1xf32>
      %cst_20 = arith.constant 2.000000e+00 : f32
      %26 = vector.broadcast %cst_20 : f32 to vector<6x1xf32>
      %27 = arith.subf %26, %25 : vector<6x1xf32>
      %28 = arith.mulf %24, %27 : vector<6x1xf32>
      %c0_21 = arith.constant 0 : index
      %c0_22 = arith.constant 0 : index
      %29 = vector.load %arg6[%c0_21, %c0_22] : memref<6x32xf32, #tpu.memory_space<vmem>>, vector<6x32xf32>
      %30 = vector.broadcast %28 : vector<6x1xf32> to vector<6x32xf32>
      %31 = arith.mulf %29, %30 : vector<6x32xf32>
      %32 = math.tanh %31 : vector<6x32xf32>
      %cst_23 = arith.constant 0.785398185 : f32
      %33 = vector.broadcast %cst_23 : f32 to vector<6x32xf32>
      %34 = arith.mulf %32, %33 : vector<6x32xf32>
      %cst_24 = arith.constant 0.785398185 : f32
      %35 = vector.broadcast %cst_24 : f32 to vector<6x32xf32>
      %36 = arith.addf %34, %35 : vector<6x32xf32>
      %37 = math.cos %36 : vector<6x32xf32>
      %38 = math.sin %36 : vector<6x32xf32>
      %cst_25 = arith.constant -1.000000e+00 : f32
      %39 = vector.broadcast %cst_25 : f32 to vector<6x32xf32>
      %40 = arith.mulf %38, %39 : vector<6x32xf32>
      %cst_26 = arith.constant 5.00000152E-10 : f32
      %41 = vector.broadcast %cst_26 : f32 to vector<6x32xf32>
      %42 = arith.mulf %38, %41 : vector<6x32xf32>
      %43 = vector.extract_strided_slice %37 {offsets = [0, 0], sizes = [6, 16], strides = [1, 1]} : vector<6x32xf32> to vector<6x16xf32>
      %44 = vector.extract_strided_slice %40 {offsets = [0, 0], sizes = [6, 16], strides = [1, 1]} : vector<6x32xf32> to vector<6x16xf32>
      %45 = vector.extract_strided_slice %42 {offsets = [0, 0], sizes = [6, 16], strides = [1, 1]} : vector<6x32xf32> to vector<6x16xf32>
      %46 = vector.extract_strided_slice %37 {offsets = [0, 16], sizes = [6, 16], strides = [1, 1]} : vector<6x32xf32> to vector<6x16xf32>
      %47 = vector.extract_strided_slice %40 {offsets = [0, 16], sizes = [6, 16], strides = [1, 1]} : vector<6x32xf32> to vector<6x16xf32>
      %48 = vector.extract_strided_slice %42 {offsets = [0, 16], sizes = [6, 16], strides = [1, 1]} : vector<6x32xf32> to vector<6x16xf32>
      %c0_27 = arith.constant 0 : index
      %c0_28 = arith.constant 0 : index
      %c0_29 = arith.constant 0 : index
      %49 = vector.load %arg4[%c0_27, %c0_28, %c0_29] : memref<3x8x16xf32, #tpu.memory_space<vmem>>, vector<3x8x16xf32>
      %cst_30 = arith.constant 0.000000e+00 : f32
      %50 = vector.broadcast %cst_30 : f32 to vector<6x16xf32>
      %51 = vector.extract_strided_slice %49 {offsets = [0, 0, 0], sizes = [1, 1, 16], strides = [1, 1, 1]} : vector<3x8x16xf32> to vector<1x1x16xf32>
      %52 = vector.shape_cast %51 : vector<1x1x16xf32> to vector<1x16xf32>
      %53 = vector.extract_strided_slice %49 {offsets = [0, 1, 0], sizes = [1, 1, 16], strides = [1, 1, 1]} : vector<3x8x16xf32> to vector<1x1x16xf32>
      %54 = vector.shape_cast %53 : vector<1x1x16xf32> to vector<1x16xf32>
      %55 = vector.extract_strided_slice %49 {offsets = [0, 2, 0], sizes = [1, 1, 16], strides = [1, 1, 1]} : vector<3x8x16xf32> to vector<1x1x16xf32>
      %56 = vector.shape_cast %55 : vector<1x1x16xf32> to vector<1x16xf32>
      %57 = vector.extract_strided_slice %49 {offsets = [0, 3, 0], sizes = [1, 1, 16], strides = [1, 1, 1]} : vector<3x8x16xf32> to vector<1x1x16xf32>
      %58 = vector.shape_cast %57 : vector<1x1x16xf32> to vector<1x16xf32>
      %59 = vector.extract_strided_slice %49 {offsets = [0, 4, 0], sizes = [1, 1, 16], strides = [1, 1, 1]} : vector<3x8x16xf32> to vector<1x1x16xf32>
      %60 = vector.shape_cast %59 : vector<1x1x16xf32> to vector<1x16xf32>
      %61 = vector.extract_strided_slice %49 {offsets = [0, 5, 0], sizes = [1, 1, 16], strides = [1, 1, 1]} : vector<3x8x16xf32> to vector<1x1x16xf32>
      %62 = vector.shape_cast %61 : vector<1x1x16xf32> to vector<1x16xf32>
      %63 = vector.extract_strided_slice %49 {offsets = [0, 6, 0], sizes = [1, 1, 16], strides = [1, 1, 1]} : vector<3x8x16xf32> to vector<1x1x16xf32>
      %64 = vector.shape_cast %63 : vector<1x1x16xf32> to vector<1x16xf32>
      %65 = vector.extract_strided_slice %49 {offsets = [0, 7, 0], sizes = [1, 1, 16], strides = [1, 1, 1]} : vector<3x8x16xf32> to vector<1x1x16xf32>
      %66 = vector.shape_cast %65 : vector<1x1x16xf32> to vector<1x16xf32>
      %67 = vector.broadcast %52 : vector<1x16xf32> to vector<6x16xf32>
      %68 = arith.mulf %67, %43 : vector<6x16xf32>
      %69 = vector.broadcast %54 : vector<1x16xf32> to vector<6x16xf32>
      %70 = arith.mulf %69, %50 : vector<6x16xf32>
      %71 = arith.subf %68, %70 : vector<6x16xf32>
      %72 = vector.broadcast %56 : vector<1x16xf32> to vector<6x16xf32>
      %73 = arith.mulf %72, %44 : vector<6x16xf32>
      %74 = arith.addf %71, %73 : vector<6x16xf32>
      %75 = vector.broadcast %58 : vector<1x16xf32> to vector<6x16xf32>
      %76 = arith.mulf %75, %45 : vector<6x16xf32>
      %77 = arith.subf %74, %76 : vector<6x16xf32>
      %78 = vector.broadcast %52 : vector<1x16xf32> to vector<6x16xf32>
      %79 = arith.mulf %78, %50 : vector<6x16xf32>
      %80 = vector.broadcast %54 : vector<1x16xf32> to vector<6x16xf32>
      %81 = arith.mulf %80, %43 : vector<6x16xf32>
      %82 = arith.addf %79, %81 : vector<6x16xf32>
      %83 = vector.broadcast %56 : vector<1x16xf32> to vector<6x16xf32>
      %84 = arith.mulf %83, %45 : vector<6x16xf32>
      %85 = arith.addf %82, %84 : vector<6x16xf32>
      %86 = vector.broadcast %58 : vector<1x16xf32> to vector<6x16xf32>
      %87 = arith.mulf %86, %44 : vector<6x16xf32>
      %88 = arith.addf %85, %87 : vector<6x16xf32>
      %89 = vector.broadcast %60 : vector<1x16xf32> to vector<6x16xf32>
      %90 = arith.mulf %89, %43 : vector<6x16xf32>
      %91 = vector.broadcast %62 : vector<1x16xf32> to vector<6x16xf32>
      %92 = arith.mulf %91, %50 : vector<6x16xf32>
      %93 = arith.subf %90, %92 : vector<6x16xf32>
      %94 = vector.broadcast %64 : vector<1x16xf32> to vector<6x16xf32>
      %95 = arith.mulf %94, %44 : vector<6x16xf32>
      %96 = arith.addf %93, %95 : vector<6x16xf32>
      %97 = vector.broadcast %66 : vector<1x16xf32> to vector<6x16xf32>
      %98 = arith.mulf %97, %45 : vector<6x16xf32>
      %99 = arith.subf %96, %98 : vector<6x16xf32>
      %100 = vector.broadcast %60 : vector<1x16xf32> to vector<6x16xf32>
      %101 = arith.mulf %100, %50 : vector<6x16xf32>
      %102 = vector.broadcast %62 : vector<1x16xf32> to vector<6x16xf32>
      %103 = arith.mulf %102, %43 : vector<6x16xf32>
      %104 = arith.addf %101, %103 : vector<6x16xf32>
      %105 = vector.broadcast %64 : vector<1x16xf32> to vector<6x16xf32>
      %106 = arith.mulf %105, %45 : vector<6x16xf32>
      %107 = arith.addf %104, %106 : vector<6x16xf32>
      %108 = vector.broadcast %66 : vector<1x16xf32> to vector<6x16xf32>
      %109 = arith.mulf %108, %44 : vector<6x16xf32>
      %110 = arith.addf %107, %109 : vector<6x16xf32>
      %111 = vector.extract_strided_slice %49 {offsets = [1, 0, 0], sizes = [1, 1, 16], strides = [1, 1, 1]} : vector<3x8x16xf32> to vector<1x1x16xf32>
      %112 = vector.shape_cast %111 : vector<1x1x16xf32> to vector<1x16xf32>
      %113 = vector.extract_strided_slice %49 {offsets = [1, 1, 0], sizes = [1, 1, 16], strides = [1, 1, 1]} : vector<3x8x16xf32> to vector<1x1x16xf32>
      %114 = vector.shape_cast %113 : vector<1x1x16xf32> to vector<1x16xf32>
      %115 = vector.extract_strided_slice %49 {offsets = [1, 2, 0], sizes = [1, 1, 16], strides = [1, 1, 1]} : vector<3x8x16xf32> to vector<1x1x16xf32>
      %116 = vector.shape_cast %115 : vector<1x1x16xf32> to vector<1x16xf32>
      %117 = vector.extract_strided_slice %49 {offsets = [1, 3, 0], sizes = [1, 1, 16], strides = [1, 1, 1]} : vector<3x8x16xf32> to vector<1x1x16xf32>
      %118 = vector.shape_cast %117 : vector<1x1x16xf32> to vector<1x16xf32>
      %119 = vector.extract_strided_slice %49 {offsets = [1, 4, 0], sizes = [1, 1, 16], strides = [1, 1, 1]} : vector<3x8x16xf32> to vector<1x1x16xf32>
      %120 = vector.shape_cast %119 : vector<1x1x16xf32> to vector<1x16xf32>
      %121 = vector.extract_strided_slice %49 {offsets = [1, 5, 0], sizes = [1, 1, 16], strides = [1, 1, 1]} : vector<3x8x16xf32> to vector<1x1x16xf32>
      %122 = vector.shape_cast %121 : vector<1x1x16xf32> to vector<1x16xf32>
      %123 = vector.extract_strided_slice %49 {offsets = [1, 6, 0], sizes = [1, 1, 16], strides = [1, 1, 1]} : vector<3x8x16xf32> to vector<1x1x16xf32>
      %124 = vector.shape_cast %123 : vector<1x1x16xf32> to vector<1x16xf32>
      %125 = vector.extract_strided_slice %49 {offsets = [1, 7, 0], sizes = [1, 1, 16], strides = [1, 1, 1]} : vector<3x8x16xf32> to vector<1x1x16xf32>
      %126 = vector.shape_cast %125 : vector<1x1x16xf32> to vector<1x16xf32>
      %127 = vector.broadcast %112 : vector<1x16xf32> to vector<6x16xf32>
      %128 = arith.mulf %127, %46 : vector<6x16xf32>
      %129 = vector.broadcast %114 : vector<1x16xf32> to vector<6x16xf32>
      %130 = arith.mulf %129, %50 : vector<6x16xf32>
      %131 = arith.subf %128, %130 : vector<6x16xf32>
      %132 = vector.broadcast %116 : vector<1x16xf32> to vector<6x16xf32>
      %133 = arith.mulf %132, %47 : vector<6x16xf32>
      %134 = arith.addf %131, %133 : vector<6x16xf32>
      %135 = vector.broadcast %118 : vector<1x16xf32> to vector<6x16xf32>
      %136 = arith.mulf %135, %48 : vector<6x16xf32>
      %137 = arith.subf %134, %136 : vector<6x16xf32>
      %138 = vector.broadcast %112 : vector<1x16xf32> to vector<6x16xf32>
      %139 = arith.mulf %138, %50 : vector<6x16xf32>
      %140 = vector.broadcast %114 : vector<1x16xf32> to vector<6x16xf32>
      %141 = arith.mulf %140, %46 : vector<6x16xf32>
      %142 = arith.addf %139, %141 : vector<6x16xf32>
      %143 = vector.broadcast %116 : vector<1x16xf32> to vector<6x16xf32>
      %144 = arith.mulf %143, %48 : vector<6x16xf32>
      %145 = arith.addf %142, %144 : vector<6x16xf32>
      %146 = vector.broadcast %118 : vector<1x16xf32> to vector<6x16xf32>
      %147 = arith.mulf %146, %47 : vector<6x16xf32>
      %148 = arith.addf %145, %147 : vector<6x16xf32>
      %149 = vector.broadcast %120 : vector<1x16xf32> to vector<6x16xf32>
      %150 = arith.mulf %149, %46 : vector<6x16xf32>
      %151 = vector.broadcast %122 : vector<1x16xf32> to vector<6x16xf32>
      %152 = arith.mulf %151, %50 : vector<6x16xf32>
      %153 = arith.subf %150, %152 : vector<6x16xf32>
      %154 = vector.broadcast %124 : vector<1x16xf32> to vector<6x16xf32>
      %155 = arith.mulf %154, %47 : vector<6x16xf32>
      %156 = arith.addf %153, %155 : vector<6x16xf32>
      %157 = vector.broadcast %126 : vector<1x16xf32> to vector<6x16xf32>
      %158 = arith.mulf %157, %48 : vector<6x16xf32>
      %159 = arith.subf %156, %158 : vector<6x16xf32>
      %160 = vector.broadcast %120 : vector<1x16xf32> to vector<6x16xf32>
      %161 = arith.mulf %160, %50 : vector<6x16xf32>
      %162 = vector.broadcast %122 : vector<1x16xf32> to vector<6x16xf32>
      %163 = arith.mulf %162, %46 : vector<6x16xf32>
      %164 = arith.addf %161, %163 : vector<6x16xf32>
      %165 = vector.broadcast %124 : vector<1x16xf32> to vector<6x16xf32>
      %166 = arith.mulf %165, %48 : vector<6x16xf32>
      %167 = arith.addf %164, %166 : vector<6x16xf32>
      %168 = vector.broadcast %126 : vector<1x16xf32> to vector<6x16xf32>
      %169 = arith.mulf %168, %47 : vector<6x16xf32>
      %170 = arith.addf %167, %169 : vector<6x16xf32>
      %171 = arith.mulf %137, %77 : vector<6x16xf32>
      %172 = arith.mulf %148, %88 : vector<6x16xf32>
      %173 = arith.subf %171, %172 : vector<6x16xf32>
      %174 = arith.mulf %137, %88 : vector<6x16xf32>
      %175 = arith.mulf %148, %77 : vector<6x16xf32>
      %176 = arith.addf %174, %175 : vector<6x16xf32>
      %177 = arith.mulf %137, %99 : vector<6x16xf32>
      %178 = arith.mulf %148, %110 : vector<6x16xf32>
      %179 = arith.subf %177, %178 : vector<6x16xf32>
      %180 = arith.mulf %137, %110 : vector<6x16xf32>
      %181 = arith.mulf %148, %99 : vector<6x16xf32>
      %182 = arith.addf %180, %181 : vector<6x16xf32>
      %183 = arith.mulf %159, %77 : vector<6x16xf32>
      %184 = arith.mulf %170, %88 : vector<6x16xf32>
      %185 = arith.subf %183, %184 : vector<6x16xf32>
      %186 = arith.mulf %159, %88 : vector<6x16xf32>
      %187 = arith.mulf %170, %77 : vector<6x16xf32>
      %188 = arith.addf %186, %187 : vector<6x16xf32>
      %189 = arith.mulf %159, %99 : vector<6x16xf32>
      %190 = arith.mulf %170, %110 : vector<6x16xf32>
      %191 = arith.subf %189, %190 : vector<6x16xf32>
      %192 = arith.mulf %159, %110 : vector<6x16xf32>
      %193 = arith.mulf %170, %99 : vector<6x16xf32>
      %194 = arith.addf %192, %193 : vector<6x16xf32>
      %195 = vector.extract_strided_slice %49 {offsets = [2, 0, 0], sizes = [1, 1, 16], strides = [1, 1, 1]} : vector<3x8x16xf32> to vector<1x1x16xf32>
      %196 = vector.shape_cast %195 : vector<1x1x16xf32> to vector<1x16xf32>
      %197 = vector.extract_strided_slice %49 {offsets = [2, 1, 0], sizes = [1, 1, 16], strides = [1, 1, 1]} : vector<3x8x16xf32> to vector<1x1x16xf32>
      %198 = vector.shape_cast %197 : vector<1x1x16xf32> to vector<1x16xf32>
      %199 = vector.extract_strided_slice %49 {offsets = [2, 2, 0], sizes = [1, 1, 16], strides = [1, 1, 1]} : vector<3x8x16xf32> to vector<1x1x16xf32>
      %200 = vector.shape_cast %199 : vector<1x1x16xf32> to vector<1x16xf32>
      %201 = vector.extract_strided_slice %49 {offsets = [2, 3, 0], sizes = [1, 1, 16], strides = [1, 1, 1]} : vector<3x8x16xf32> to vector<1x1x16xf32>
      %202 = vector.shape_cast %201 : vector<1x1x16xf32> to vector<1x16xf32>
      %203 = vector.extract_strided_slice %49 {offsets = [2, 4, 0], sizes = [1, 1, 16], strides = [1, 1, 1]} : vector<3x8x16xf32> to vector<1x1x16xf32>
      %204 = vector.shape_cast %203 : vector<1x1x16xf32> to vector<1x16xf32>
      %205 = vector.extract_strided_slice %49 {offsets = [2, 5, 0], sizes = [1, 1, 16], strides = [1, 1, 1]} : vector<3x8x16xf32> to vector<1x1x16xf32>
      %206 = vector.shape_cast %205 : vector<1x1x16xf32> to vector<1x16xf32>
      %207 = vector.extract_strided_slice %49 {offsets = [2, 6, 0], sizes = [1, 1, 16], strides = [1, 1, 1]} : vector<3x8x16xf32> to vector<1x1x16xf32>
      %208 = vector.shape_cast %207 : vector<1x1x16xf32> to vector<1x16xf32>
      %209 = vector.extract_strided_slice %49 {offsets = [2, 7, 0], sizes = [1, 1, 16], strides = [1, 1, 1]} : vector<3x8x16xf32> to vector<1x1x16xf32>
      %210 = vector.shape_cast %209 : vector<1x1x16xf32> to vector<1x16xf32>
      %211 = vector.broadcast %196 : vector<1x16xf32> to vector<6x16xf32>
      %212 = arith.mulf %211, %185 : vector<6x16xf32>
      %213 = vector.broadcast %198 : vector<1x16xf32> to vector<6x16xf32>
      %214 = arith.mulf %213, %188 : vector<6x16xf32>
      %215 = arith.subf %212, %214 : vector<6x16xf32>
      %216 = vector.broadcast %200 : vector<1x16xf32> to vector<6x16xf32>
      %217 = arith.mulf %216, %191 : vector<6x16xf32>
      %218 = arith.addf %215, %217 : vector<6x16xf32>
      %219 = vector.broadcast %202 : vector<1x16xf32> to vector<6x16xf32>
      %220 = arith.mulf %219, %194 : vector<6x16xf32>
      %221 = arith.subf %218, %220 : vector<6x16xf32>
      %222 = vector.broadcast %196 : vector<1x16xf32> to vector<6x16xf32>
      %223 = arith.mulf %222, %188 : vector<6x16xf32>
      %224 = vector.broadcast %198 : vector<1x16xf32> to vector<6x16xf32>
      %225 = arith.mulf %224, %185 : vector<6x16xf32>
      %226 = arith.addf %223, %225 : vector<6x16xf32>
      %227 = vector.broadcast %200 : vector<1x16xf32> to vector<6x16xf32>
      %228 = arith.mulf %227, %194 : vector<6x16xf32>
      %229 = arith.addf %226, %228 : vector<6x16xf32>
      %230 = vector.broadcast %202 : vector<1x16xf32> to vector<6x16xf32>
      %231 = arith.mulf %230, %191 : vector<6x16xf32>
      %232 = arith.addf %229, %231 : vector<6x16xf32>
      %233 = vector.broadcast %204 : vector<1x16xf32> to vector<6x16xf32>
      %234 = arith.mulf %233, %185 : vector<6x16xf32>
      %235 = vector.broadcast %206 : vector<1x16xf32> to vector<6x16xf32>
      %236 = arith.mulf %235, %188 : vector<6x16xf32>
      %237 = arith.subf %234, %236 : vector<6x16xf32>
      %238 = vector.broadcast %208 : vector<1x16xf32> to vector<6x16xf32>
      %239 = arith.mulf %238, %191 : vector<6x16xf32>
      %240 = arith.addf %237, %239 : vector<6x16xf32>
      %241 = vector.broadcast %210 : vector<1x16xf32> to vector<6x16xf32>
      %242 = arith.mulf %241, %194 : vector<6x16xf32>
      %243 = arith.subf %240, %242 : vector<6x16xf32>
      %244 = vector.broadcast %204 : vector<1x16xf32> to vector<6x16xf32>
      %245 = arith.mulf %244, %188 : vector<6x16xf32>
      %246 = vector.broadcast %206 : vector<1x16xf32> to vector<6x16xf32>
      %247 = arith.mulf %246, %185 : vector<6x16xf32>
      %248 = arith.addf %245, %247 : vector<6x16xf32>
      %249 = vector.broadcast %208 : vector<1x16xf32> to vector<6x16xf32>
      %250 = arith.mulf %249, %194 : vector<6x16xf32>
      %251 = arith.addf %248, %250 : vector<6x16xf32>
      %252 = vector.broadcast %210 : vector<1x16xf32> to vector<6x16xf32>
      %253 = arith.mulf %252, %191 : vector<6x16xf32>
      %254 = arith.addf %251, %253 : vector<6x16xf32>
      %255 = arith.mulf %173, %173 : vector<6x16xf32>
      %256 = arith.mulf %176, %176 : vector<6x16xf32>
      %257 = arith.addf %255, %256 : vector<6x16xf32>
      %258 = arith.mulf %221, %221 : vector<6x16xf32>
      %259 = arith.addf %257, %258 : vector<6x16xf32>
      %260 = arith.mulf %232, %232 : vector<6x16xf32>
      %261 = arith.addf %259, %260 : vector<6x16xf32>
      %262 = math.sqrt %261 : vector<6x16xf32>
      %263 = arith.mulf %179, %179 : vector<6x16xf32>
      %264 = arith.mulf %182, %182 : vector<6x16xf32>
      %265 = arith.addf %263, %264 : vector<6x16xf32>
      %266 = arith.mulf %243, %243 : vector<6x16xf32>
      %267 = arith.addf %265, %266 : vector<6x16xf32>
      %268 = arith.mulf %254, %254 : vector<6x16xf32>
      %269 = arith.addf %267, %268 : vector<6x16xf32>
      %270 = math.sqrt %269 : vector<6x16xf32>
      %271 = tpu.concatenate %262, %270 in 1 : vector<6x16xf32>, vector<6x16xf32> -> vector<6x32xf32>
      %c0_31 = arith.constant 0 : index
      %c0_32 = arith.constant 0 : index
      %c0_33 = arith.constant 0 : index
      %272 = vector.load %arg5[%c0_31, %c0_32, %c0_33] : memref<6x1x32xf32, #tpu.memory_space<vmem>>, vector<6x1x32xf32>
      %273 = vector.shape_cast %272 : vector<6x1x32xf32> to vector<6x32xf32>
      %274 = vector.shape_cast %271 : vector<6x32xf32> to vector<6x1x32xf32>
      tpu.vector_store %arg5[%c0_31, %c0_32, %c0_33], %274 {strides = array<i32>} : memref<6x1x32xf32, #tpu.memory_space<vmem>>, vector<6x1x32xf32>,
    } else {
    }
    return
  }
  func.func @transform_0(%arg0: i32, %arg1: i32) -> (i32, i32, i32) {
    %c0_i32 = arith.constant 0 : i32
    %c0_i32_0 = arith.constant 0 : i32
    return %arg0, %arg1, %c0_i32 : i32, i32, i32
  }
  func.func @transform_1(%arg0: i32, %arg1: i32) -> (i32, i32, i32) {
    %c0_i32 = arith.constant 0 : i32
    %c0_i32_0 = arith.constant 0 : i32
    return %arg0, %c0_i32, %arg1 : i32, i32, i32
  }
  func.func @transform_2(%arg0: i32, %arg1: i32) -> (i32, i32, i32) {
    %c0_i32 = arith.constant 0 : i32
    %c0_i32_0 = arith.constant 0 : i32
    %c0_i32_1 = arith.constant 0 : i32
    %c0_i32_2 = arith.constant 0 : i32
    return %c0_i32, %c0_i32_0, %c0_i32_1 : i32, i32, i32
  }
  func.func @transform_3(%arg0: i32, %arg1: i32) -> (i32, i32, i32) {
    %c0_i32 = arith.constant 0 : i32
    %c0_i32_0 = arith.constant 0 : i32
    %c0_i32_1 = arith.constant 0 : i32
    return %arg0, %c0_i32, %c0_i32_0 : i32, i32, i32
  }
}

</mosaic_0001>

<bundles_post_ra>
// kernel: tpu_custom_call.1
= control target key start
LH: loop header
LB: loop body
LE: loop exit
PB: predicated region body
PF: predicated region fallthrough
CT: control target
= control target key end

     0   :  { %8 = vsyncpa [#allocation5], 0  ;;  %s1171_s0 = inlined_call_operand.hbm [shape: f32[6,8,32], index: 0, kind: input, shape index: {}]   ;;  %s1172_s1 = inlined_call_operand.hbm [shape: f32[6,1,8], index: 1, kind: input, shape index: {}]   ;;  %s1173_s2 = inlined_call_operand.hbm [shape: f32[3,8,16], index: 2, kind: input, shape index: {}]   ;;  %s1174_s3 = inlined_call_operand.hbm [shape: f32[6,1,32], index: 3, kind: output, shape index: {}]  }
   0x1   :  { %9 = vsyncpa [#allocation8], 0 }
   0x2   :  { %10 = vsyncpa [#allocation6], 0  ;;  %s941_s12 = smov [#allocation7]   ;;  %s847_s16 = scalar_lea.hbm %s1172_s1, 96 }
   0x3   :  { %s28_s13 = sshll.u32 %s941_s12, 4  ;;  %p848_p0 = scmp.ne.s32.totalorder %s1172_s1, %s847_s16  ;;  %s29_s13 = int_to_ptr.vmem [resolvable:$true] %s28_s13 }
   0x4   :  { %p851_p1 = scmp.lt.u32.totalorder %s847_s16, %s1172_s1 }
   0x6   :  { %p853_p2 = pnand %p851_p1, %p848_p0 }
   0x8   :  { %856 = shalt.err (!%p853_p2)
}
   0x9   :  { %s857_s21 = scalar_lea.vmem %s29_s13, 96  ;;  %p862_p4 = scmp.lt.s32.totalorder %s29_s13, %s29_s13 }
   0xa   :  { %p858_p3 = scmp.ne.s32.totalorder %s29_s13, %s857_s21  ;;  %p863_p5 = scmp.lt.s32.totalorder %s857_s21, %s857_s21 }
   0xc   :  { %p864_p6 = por %p863_p5, %p862_p4 }
   0xe   :  { %p865_p7 = pnand %p864_p6, %p858_p3 }
  0x10   :  { %868 = shalt.err (!%p865_p7)
}
  0x11   :  { %s942_s22 = smov 16   ;;  %s943_s23 = smov 1  }
  0x12   :  { %34 = dma.hbm_to_vmem [thread:$0]  %s1172_s1, 96, %s29_s13, [#allocation8], %s942_s22, %s942_s22, %s943_s23  }
  0x13   :  { %s944_s26 = smov [#allocation4]   ;;  %s869_s30 = scalar_lea.hbm %s1171_s0, 768 }
  0x14   :  { %s16_s27 = sshll.u32 %s944_s26, 4  ;;  %p870_p8 = scmp.ne.s32.totalorder %s1171_s0, %s869_s30  ;;  %s17_s27 = int_to_ptr.vmem [resolvable:$true] %s16_s27 }
  0x15   :  { %p873_p9 = scmp.lt.u32.totalorder %s869_s30, %s1171_s0 }
  0x17   :  { %p875_p10 = pnand %p873_p9, %p870_p8 }
  0x19   :  { %878 = shalt.err (!%p875_p10)
}
  0x1a   :  { %s879_s8 = scalar_lea.vmem %s17_s27, 768  ;;  %p884_p12 = scmp.lt.s32.totalorder %s17_s27, %s17_s27 }
  0x1b   :  { %p880_p11 = scmp.ne.s32.totalorder %s17_s27, %s879_s8  ;;  %p885_p13 = scmp.lt.s32.totalorder %s879_s8, %s879_s8 }
  0x1d   :  { %p886_p0 = por %p885_p13, %p884_p12 }
  0x1f   :  { %p887_p1 = pnand %p886_p0, %p880_p11 }
  0x21   :  { %890 = shalt.err (!%p887_p1)
}
  0x22   :  { %s945_s1 = smov 128   ;;  %s946_s9 = smov 8  }
  0x23   :  { %22 = dma.hbm_to_vmem [thread:$0]  %s1171_s0, 768, %s17_s27, [#allocation5], %s945_s1, %s945_s1, %s946_s9  }
  0x24   :  { %s947_s12 = smov [#allocation9]   ;;  %s891_s16 = scalar_lea.hbm %s1173_s2, 384 }
  0x25   :  { %s40_s13 = sshll.u32 %s947_s12, 4  ;;  %p892_p2 = scmp.ne.s32.totalorder %s1173_s2, %s891_s16  ;;  %s41_s13 = int_to_ptr.vmem [resolvable:$true] %s40_s13 }
  0x26   :  { %p895_p3 = scmp.lt.u32.totalorder %s891_s16, %s1173_s2 }
  0x28   :  { %p897_p4 = pnand %p895_p3, %p892_p2 }
  0x2a   :  { %900 = shalt.err (!%p897_p4)
}
  0x2b   :  { %s901_s21 = scalar_lea.vmem %s41_s13, 384  ;;  %p906_p6 = scmp.lt.s32.totalorder %s41_s13, %s41_s13 }
  0x2c   :  { %p902_p5 = scmp.ne.s32.totalorder %s41_s13, %s901_s21  ;;  %p907_p7 = scmp.lt.s32.totalorder %s901_s21, %s901_s21 }
  0x2e   :  { %p908_p8 = por %p907_p7, %p906_p6 }
  0x30   :  { %p909_p9 = pnand %p908_p8, %p902_p5 }
  0x32   :  { %912 = shalt.err (!%p909_p9)
}
  0x33   :  { %46 = dma.hbm_to_vmem [thread:$0]  %s1173_s2, 384, %s41_s13, [#allocation8], %s945_s1, %s945_s1, %s946_s9  }
  0x34   :  { %935 = dma.done.wait [#allocation5], 768  }
  0x35   :  { %936 = vsyncadd [#allocation5], 4294966528 }
  0x36   :  { %937 = dma.done.wait [#allocation8], 480  }
  0x37   :  { %938 = vsyncadd [#allocation8], 4294966816  ;;  %v76_v0 = vlaneseq  ;;  %vm60_vm0 = vcmask 259072   ;;  %v948_v1 = vmov 1966171168   ;;  %vm62_vm1 = vcmask 5120  }
  0x38   :  { %v199_v2 = vunpack.c.l.s4 %v948_v1  ;;  %v949_v4 = vmov 0.0   ;;  %v64_v8 = vld [vmem:[#allocation7] sm:$0x1]  ;;  %v65_v9 = vld [vmem:[#allocation7 + $0x1] sm:$0x1]  ;;  %vm236_vm2 = vcmask 62464  }
  0x39   :  { %v1018_v3 = vshrl.u32 %v76_v0, 7  ;;  %61 = vst.msk [vmem:[#allocation2] sm:$0x3f] %vm60_vm0, %v949_v4  ;;  %v66_v10 = vld [vmem:[#allocation7 + $0x2] sm:$0x1]  ;;  %v195_v14 = vcombine.low %v64_v8, %v65_v9  ;;  %v950_v30 = vmov 0  }
  0x3a   :  { %63 = vst.msk [vmem:[#allocation3] sm:$0x3f] %vm62_vm1, %v949_v4  ;;  %v200_v5 = vunpack.c.0.s8 %v199_v2  ;;  %v67_v11 = vld [vmem:[#allocation7 + $0x3] sm:$0x1]  ;;  %v68_v12 = vld [vmem:[#allocation7 + $0x4] sm:$0x1]  ;;  %833 = vset.pattern.permute.xlu1 %v950_v30  ;;  %834 = vset.pattern.permute.xlu0 %v950_v30 }
  0x3b   :  { %v1023_v6 = vsub.s32 0, %v1018_v3  ;;  %v69_v13 = vld [vmem:[#allocation7 + $0x5] sm:$0x1]  ;;  %v196_v16 = vcombine.low %v66_v10, %v67_v11  ;;  %v71_v36 = vld [vmem:[#allocation4 + $0x8] sm:$0xff]  ;;  %v73_v38 = vld [vmem:[#allocation4 + $0x18] sm:$0xff]  ;;  %vm125_vm3 = vcmask 261120  }
  0x3c   :  { %v1026_v7 = vsub.s32 %v200_v5, %v1018_v3  ;;  %v197_v17 = vcombine.low %v68_v12, %v69_v13  ;;  %v72_v37 = vld [vmem:[#allocation4 + $0x10] sm:$0xff]  ;;  %v74_v40 = vld [vmem:[#allocation4 + $0x20] sm:$0xff]  ;;  %v75_v42 = vld [vmem:[#allocation4 + $0x28] sm:$0xff]  ;;  %vm174_vm4 = vcmask 1041409   ;;  %vm176_vm5 = vcmask 1042434   ;;  %s957_s2 = smov 112  }
  0x3d   :  { %v86_v15 = vrot.slane %v65_v9, %v1023_v6  ;;  %v93_v19 = vrot.slane %v66_v10, %v1023_v6  ;;  %v100_v24 = vrot.slane %v67_v11, %v1023_v6  ;;  %v107_v27 = vrot.slane %v68_v12, %v1023_v6  ;;  %v70_v63 = vld [vmem:[#allocation4] sm:$0xff]  ;;  %s958_s25 = smov [#allocation10]  }
  0x3e   :  { %v204_v18 = vrot.slane %v195_v14, %v1026_v7  ;;  %v211_v20 = vrot.slane %v196_v16, %v1026_v7  ;;  %v218_v21 = vrot.slane %v197_v17, %v1026_v7  ;;  %v114_v29 = vrot.slane %v69_v13, %v1023_v6  ;;  %s790_s26 = sshll.u32 %s958_s25, 4  ;;  %s791_s26 = int_to_ptr.vmem [resolvable:$true] %s790_s26 }
  0x3f   :  { %88 = vbcast.lane.b32.xlu1 %v86_v15, 256  ;;  %v79_v31 = vrot.slane %v64_v8, %v1023_v6  ;;  %vm178_vm6 = vcmask 1043459   ;;  %vm180_vm7 = vcmask 1044484   ;;  %vm182_vm8 = vcmask 1045509   ;;  %s913_s27 = scalar_lea.vmem %s791_s26, 96  ;;  %p918_p11 = scmp.lt.s32.totalorder %s791_s26, %s791_s26 }
  0x40   :  { %v219_v22 = vcombine.low %v204_v18, %v211_v20  ;;  %v233_v23 = vrot.slane %v218_v21, %v1026_v7  ;;  %p914_p10 = scmp.ne.s32.totalorder %s791_s26, %s913_s27  ;;  %p919_p12 = scmp.lt.s32.totalorder %s913_s27, %s913_s27 }
  0x41   :  { %v188_v54 = vld [vmem:[#allocation3] sm:$0x3f] }
  0x42   :  { %v226_v25 = vrot.slane %v219_v22, %v1026_v7  ;;  %p920_p13 = por %p919_p12, %p918_p11 }
  0x43   :  { %95 = vbcast.lane.b32.xlu1 %v93_v19, 256 }
  0x44   :  { %v234_v26 = vcombine.low %v226_v25, %v233_v23  ;;  %p921_p0 = pnand %p920_p13, %p914_p10 }
  0x46   :  { %v237_v28 = vsel %vm236_vm2, %v234_v26, 0.0 }
  0x47   :  { %102 = vbcast.lane.b32.xlu1 %v100_v24, 256  ;;  %238 = vadd.xlane.f32.xlu0 %v237_v28 }
  0x4b   :  { %109 = vbcast.lane.b32.xlu1 %v107_v27, 256 }
  0x4f   :  { %116 = vbcast.lane.b32.xlu1 %v114_v29, 256 }
  0x5d   :  { %81 = vbcast.lane.b32.xlu0 %v79_v31, 256 }
  0xb1   :  { %v89_v32 = vpop.permute.xlu1 %88 }
  0xb2   :  { %v119_v39 = vmul.f32 %v89_v32, %v71_v36 }
  0xb4   :  { %v133_v46 = vsel %vm125_vm3, %v119_v39, 0.0 }
  0xb5   :  { %v96_v33 = vpop.permute.xlu1 %95  ;;  %v134_v50 = vrot.slane %v133_v46, 4 }
  0xb6   :  { %v120_v41 = vmul.f32 %v96_v33, %v72_v37 }
  0xb7   :  { %v135_v58 = vadd.f32 %v134_v50, %v133_v46 }
  0xb8   :  { %v140_v48 = vsel %vm125_vm3, %v120_v41, 0.0 }
  0xb9   :  { %v103_v34 = vpop.permute.xlu1 %102  ;;  %v141_v52 = vrot.slane %v140_v48, 4  ;;  %v136_v1 = vrot.slane %v135_v58, 2 }
  0xba   :  { %v121_v44 = vmul.f32 %v103_v34, %v73_v38  ;;  %v124_v38 = vld [vmem:[#allocation2] sm:$0x3f] }
  0xbb   :  { %v142_v61 = vadd.f32 %v141_v52, %v140_v48  ;;  %v137_v12 = vadd.f32 %v136_v1, %v135_v58  ;;  %v952_v1 = vmov 2475754826  }
  0xbc   :  { %v147_v49 = vsel %vm125_vm3, %v121_v44, 0.0 }
  0xbd   :  { %v110_v35 = vpop.permute.xlu1 %109  ;;  %v148_v55 = vrot.slane %v147_v49, 4  ;;  %v143_v5 = vrot.slane %v142_v61, 2  ;;  %v138_v21 = vrot.slane %v137_v12, 1 }
  0xbe   :  { %v122_v45 = vmul.f32 %v110_v35, %v74_v40 }
  0xbf   :  { %v149_v62 = vadd.f32 %v148_v55, %v147_v49  ;;  %v144_v15 = vadd.f32 %v143_v5, %v142_v61  ;;  %v139_v28 = vadd.f32 %v138_v21, %v137_v12  ;;  %v953_v5 = vmov 2131351028  }
  0xc0   :  { %v154_v51 = vsel %vm125_vm3, %v122_v45, 0.0 }
  0xc1   :  { %v117_v43 = vpop.permute.xlu1 %116  ;;  %v155_v56 = vrot.slane %v154_v51, 4  ;;  %v150_v9 = vrot.slane %v149_v62, 2  ;;  %v145_v24 = vrot.slane %v144_v15, 1 }
  0xc2   :  { %v123_v47 = vmul.f32 %v117_v43, %v75_v42 }
  0xc3   :  { %v156_v0 = vadd.f32 %v155_v56, %v154_v51  ;;  %v151_v17 = vadd.f32 %v150_v9, %v149_v62  ;;  %v146_v31 = vadd.f32 %v145_v24, %v144_v15 }
  0xc4   :  { %v161_v53 = vsel %vm125_vm3, %v123_v47, 0.0 }
  0xc5   :  { %v162_v59 = vrot.slane %v161_v53, 4  ;;  %v157_v10 = vrot.slane %v156_v0, 2  ;;  %v152_v25 = vrot.slane %v151_v17, 1 }
  0xc7   :  { %v163_v4 = vadd.f32 %v162_v59, %v161_v53  ;;  %v158_v20 = vadd.f32 %v157_v10, %v156_v0  ;;  %v153_v32 = vadd.f32 %v152_v25, %v151_v17  ;;  %v954_v10 = vmov 2102212464  }
  0xc9   :  { %v164_v14 = vrot.slane %v163_v4, 2  ;;  %v159_v27 = vrot.slane %v158_v20, 1 }
  0xcb   :  { %v165_v23 = vadd.f32 %v164_v14, %v163_v4  ;;  %v160_v34 = vadd.f32 %v159_v27, %v158_v20 }
  0xcd   :  { %v166_v30 = vrot.slane %v165_v23, 1 }
  0xcf   :  { %v167_v36 = vadd.f32 %v166_v30, %v165_v23 }
  0xd4   :  { %v239_v57 = vpop.xlane.xlu0 %238 }
  0xd5   :  { %v240_v60 = vadd.f32 %v239_v57, %v188_v54 }
  0xd7   :  { %242 = vst.msk [vmem:[#allocation3] sm:$0x3f] %vm62_vm1, %v240_v60 }
  0xd8   :  { %v82_v2 = vpop.permute.xlu0 %81 }
  0xd9   :  { %v118_v8 = vmul.f32 %v82_v2, %v70_v63  ;;  %v951_v63 = vmov 683565275  }
  0xdb   :  { %v126_v11 = vsel %vm125_vm3, %v118_v8, 0.0 }
  0xdc   :  { %v127_v13 = vrot.slane %v126_v11, 4 }
  0xde   :  { %v246_v16 = vld [vmem:[#allocation3] sm:$0x3f]  ;;  %v128_v18 = vadd.f32 %v127_v13, %v126_v11  ;;  %v955_v13 = vmov 920167782  }
  0xdf   :  { %v247_v19 = vmax.f32 %v246_v16, 1e-09  ;;  %v956_v16 = vmov 1326507024  }
  0xe0   :  { %v129_v22 = vrot.slane %v128_v18, 2 }
  0xe1   :  { %835 = vrcp.f32 %v247_v19 }
  0xe2   :  { %v130_v26 = vadd.f32 %v129_v22, %v128_v18 }
  0xe4   :  { %v131_v29 = vrot.slane %v130_v26, 1 }
  0xe6   :  { %v132_v33 = vadd.f32 %v131_v29, %v130_v26 }
  0xe8   :  { %v175_v35 = vsel %vm174_vm4, %v139_v28, %v132_v33 }
  0xe9   :  { %v177_v37 = vsel %vm176_vm5, %v146_v31, %v175_v35 }
  0xea   :  { %v179_v39 = vsel %vm178_vm6, %v153_v32, %v177_v37 }
  0xeb   :  { %v836_v40 = vpop.eup %835  ;;  %v181_v41 = vsel %vm180_vm7, %v160_v34, %v179_v39 }
  0xec   :  { %v249_v42 = vmul.f32 %v836_v40, %v247_v19  ;;  %v183_v43 = vsel %vm182_vm8, %v167_v36, %v181_v41 }
  0xed   :  { %v185_v44 = vadd.f32 %v183_v43, %v124_v38 }
  0xee   :  { %v250_v45 = vsub.f32 2.0, %v249_v42 }
  0xef   :  { %187 = vst.msk [vmem:[#allocation2] sm:$0x3f] %vm60_vm0, %v185_v44 }
  0xf0   :  { %v251_v46 = vmul.f32 %v836_v40, %v250_v45 }
  0xf2   :  { %255 = vperm.xlu1 %833, %v251_v46  }
  0xf6   :  { %v252_v48 = vld [vmem:[#allocation2] sm:$0x3f] }
 0x171   :  { %v256_v47 = vpop.permute.xlu1 %255 }
 0x172   :  { %v258_v49 = vmul.f32 %v256_v47, %v252_v48 }
 0x174   :  { %837 = vtanh.f32 %v258_v49 }
 0x17e   :  { %v838_v50 = vpop.eup %837 }
 0x17f   :  { %v260_v51 = vmul.f32 0.7853982, %v838_v50 }
 0x181   :  { %v1047_v52 = vadd.f32 0.7853982, %v260_v51 }
 0x183   :  { %v265_v53 = vand.u32 2139095040, %v1047_v52  ;;  %v262_v57 = vand.u32 2147483647, %v1047_v52  ;;  %vm264_vm0 = vcmp.lt.s32.totalorder %v1047_v52, 0  ;;  %vm354_vm8 = vweird.f32 %v1047_v52 }
 0x185   :  { %v266_v54 = vshrl.u32 %v265_v53, 23  ;;  %v269_v60 = vand.u32 8388607, %v262_v57  ;;  %vm263_vm1 = vcmp.le.f32.partialorder %v262_v57, 0.7853982 }
 0x187   :  { %v803_v55 = vadd.s32 4294967169, %v266_v54  ;;  %v270_v18 = vor.u32 8388608, %v269_v60 }
 0x189   :  { %v272_v56 = vadd.s32 1, %v803_v55  ;;  %v310_v32 = vshll.u32 %v270_v18, 8  ;;  %v1074_v18 = vsub.s32 4, %v1018_v3 }
 0x18b   :  { %vm273_vm9 = vcmp.gt.s32.totalorder %v272_v56, 0 }
 0x18c   :  { %v274_v58 = vsel %vm273_vm9, %v272_v56, 0 }
 0x18d   :  { %v276_v59 = vand.u32 31, %v274_v58  ;;  %v275_v62 = vshrl.u32 %v274_v58, 5 }
 0x18f   :  { %v277_v61 = vsub.s32 32, %v276_v59  ;;  %v279_v0 = vshll.u32 %v951_v63, %v276_v59  ;;  %v282_v2 = vshll.u32 %v952_v1, %v276_v59  ;;  %v285_v9 = vshll.u32 %v953_v5, %v276_v59 }
 0x190   :  { %v288_v12 = vshll.u32 %v954_v10, %v276_v59  ;;  %v291_v15 = vshll.u32 %v955_v13, %v276_v59  ;;  %vm294_vm10 = vcmp.lt.s32.totalorder %v275_v62, 1  ;;  %vm297_vm11 = vcmp.lt.s32.totalorder %v275_v62, 4 }
 0x191   :  { %v280_v4 = vshrl.u32 %v952_v1, %v277_v61  ;;  %v283_v8 = vshrl.u32 %v953_v5, %v277_v61  ;;  %v286_v11 = vshrl.u32 %v954_v10, %v277_v61  ;;  %v289_v14 = vshrl.u32 %v955_v13, %v277_v61 }
 0x192   :  { %v292_v17 = vshrl.u32 %v956_v16, %v277_v61  ;;  %v278_v27 = vshrl.u32 %v951_v63, %v277_v61  ;;  %vm296_vm12 = vcmp.lt.s32.totalorder %v275_v62, 3  ;;  %vm295_vm13 = vcmp.lt.s32.totalorder %v275_v62, 2  ;;  %v471_v16 = vld [vmem:[#allocation9] sm:$0xff] }
 0x193   :  { %v281_v19 = vor.u32 %v280_v4, %v279_v0  ;;  %v284_v20 = vor.u32 %v283_v8, %v282_v2  ;;  %v287_v21 = vor.u32 %v286_v11, %v285_v9  ;;  %v290_v22 = vor.u32 %v289_v14, %v288_v12 }
 0x194   :  { %v293_v23 = vor.u32 %v292_v17, %v291_v15  ;;  %v1068_v14 = vsub.s32 1, %v1018_v3  ;;  %v1071_v17 = vsub.s32 5, %v1018_v3 }
 0x195   :  { %v299_v24 = vsel %vm297_vm11, %v287_v21, 2102212464  ;;  %v302_v25 = vsel %vm294_vm10, %v281_v19, %v284_v20  ;;  %v306_v26 = vsel %vm294_vm10, %v284_v20, %v287_v21  ;;  %v303_v28 = vsel %vm297_vm11, %v290_v22, 920167782 }
 0x196   :  { %v307_v29 = vsel %vm297_vm11, %v293_v23, 1326507024  ;;  %v304_v30 = vsel %vm296_vm12, %v287_v21, %v303_v28  ;;  %v298_v33 = vsel %vm294_vm10, %v278_v27, %v281_v19  ;;  %v300_v34 = vsel %vm296_vm12, %v284_v20, %v299_v24 }
 0x197   :  { %v308_v31 = vsel %vm296_vm12, %v290_v22, %v307_v29  ;;  %v305_v35 = vsel %vm295_vm13, %v302_v25, %v304_v30  ;;  %v301_v41 = vsel %vm295_vm13, %v298_v33, %v300_v34  ;;  %v477_v19 = vrot.slane %v471_v16, %v1023_v6 }
 0x198   :  { %v309_v36 = vsel %vm295_vm13, %v306_v26, %v308_v31  ;;  %v1056_v39 = vmul.u32.u64.low %v310_v32, %v305_v35  ;;  %v1057_v40 = vmul.u32.u64.high %v310_v32, %v305_v35, %v1056_v39  ;;  %v317_v43 = vmul.u32 %v310_v32, %v301_v41 }
 0x199   :  { %v1053_v37 = vmul.u32.u64.low %v310_v32, %v309_v36  ;;  %v1054_v38 = vmul.u32.u64.high %v310_v32, %v309_v36, %v1053_v37  ;;  %v482_v57 = vrot.slane %v471_v16, %v1068_v14  ;;  %v512_v22 = vrot.slane %v471_v16, %v1071_v17 }
 0x19a   :  { %v320_v42 = vadd.s32 1, %v1057_v40  ;;  %v507_v24 = vrot.slane %v471_v16, %v1074_v18  ;;  %v1081_v25 = vsub.s32 2, %v1018_v3  ;;  %v1084_v26 = vsub.s32 3, %v1018_v3 }
 0x19b   :  { %vm319_vm14 = vc.u32 %v1054_v38, %v1056_v39  ;;  %v318_v56 = vadd.s32 %v1056_v39, %v1054_v38  ;;  %v1087_v27 = vsub.s32 6, %v1018_v3  ;;  %v483_v30 = vmul.f32 0.0, %v482_v57 }
 0x19c   :  { %v321_v44 = vsel %vm319_vm14, %v320_v42, %v1057_v40  ;;  %v497_v31 = vmul.f32 0.0, %v477_v19  ;;  %v1090_v32 = vsub.s32 7, %v1018_v3  ;;  %v513_v34 = vmul.f32 0.0, %v512_v22 }
 0x19d   :  { %v322_v45 = vadd.s32 %v321_v44, %v317_v43  ;;  %v488_v41 = vrot.slane %v471_v16, %v1081_v25  ;;  %v527_v43 = vmul.f32 0.0, %v507_v24  ;;  %v518_v44 = vrot.slane %v471_v16, %v1087_v27 }
 0x19e   :  { %vm722_vm12 = vcmask 130048   ;;  %vm778_vm14 = vcmask 253952  }
 0x19f   :  { %v323_v46 = vadd.s32 536870912, %v322_v45 }
 0x1a1   :  { %v324_v47 = vshrl.u32 %v323_v46, 30 }
 0x1a3   :  { %v325_v48 = vshll.u32 %v324_v47, 30  ;;  %v348_v8 = vsub.s32 4, %v324_v47 }
 0x1a5   :  { %v326_v49 = vsub.s32 %v322_v45, %v325_v48  ;;  %v349_v11 = vsel %vm264_vm0, %v348_v8, %v324_v47 }
 0x1a6   :  { %v351_v13 = vsel %vm263_vm1, 0, %v349_v11 }
 0x1a7   :  { %v328_v50 = vsub.s32 0, %v326_v49  ;;  %v458_v15 = vadd.s32 3, %v351_v13  ;;  %v355_v20 = vand.u32 3, %v351_v13  ;;  %v472_v13 = vld [vmem:[#allocation9 + $0x8] sm:$0xff] }
 0x1a9   :  { %v804_v51 = vmin.u32 %v328_v50, %v326_v49  ;;  %v459_v21 = vand.u32 3, %v458_v15  ;;  %vm360_vm2 = vcmp.eq.s32.totalorder %v355_v20, 2  ;;  %vm357_vm4 = vcmp.eq.s32.totalorder %v355_v20, 0 }
 0x1aa   :  { %vm356_vm6 = vcmp.lt.s32.totalorder %v355_v20, 2  ;;  %v546_v15 = vrot.slane %v472_v13, %v1068_v14  ;;  %v1105_v20 = vld [vmem:[#allocation9 + $0x10] sm:$0xff] }
 0x1ab   :  { %v330_v53 = vclz %v804_v51  ;;  %vm464_vm3 = vcmp.eq.s32.totalorder %v459_v21, 2  ;;  %vm461_vm5 = vcmp.eq.s32.totalorder %v459_v21, 0  ;;  %vm460_vm7 = vcmp.lt.s32.totalorder %v459_v21, 2 }
 0x1ac   :  { %v494_v51 = vrot.slane %v471_v16, %v1084_v26  ;;  %v547_v21 = vmul.f32 0.0, %v546_v15 }
 0x1ad   :  { %v805_v54 = vadd.s32 4294967294, %v330_v53 }
 0x1af   :  { %vm806_vm15 = vcmp.lt.s32.totalorder %v805_v54, 0 }
 0x1b0   :  { %v333_v55 = vsel %vm806_vm15, 0, %v805_v54 }
 0x1b1   :  { %v334_v58 = vsub.s32 32, %v333_v55  ;;  %v338_v59 = vsub.s32 4294967266, %v333_v55  ;;  %v335_v60 = vshll.u32 %v326_v49, %v333_v55  ;;  %v524_v55 = vrot.slane %v471_v16, %v1090_v32 }
 0x1b2   :  { %v584_v16 = vrot.slane %v472_v13, %v1071_v17 }
 0x1b3   :  { %v336_v61 = vshrl.u32 %v318_v56, %v334_v58  ;;  %v339_v62 = vadd.s32 127, %v338_v59 }
 0x1b5   :  { %v337_v63 = vor.u32 %v336_v61, %v335_v60  ;;  %v340_v0 = vshll.u32 %v339_v62, 23 }
 0x1b7   :  { %v341_v1 = vor.u32 4788187, %v340_v0  ;;  %v344_v4 = vcvt.s32.f32 %v337_v63 }
 0x1b9   :  { %v342_v2 = vand.u32 2147483647, %v341_v1 }
 0x1bb   :  { %v345_v5 = vmul.f32 %v344_v4, %v342_v2 }
 0x1bd   :  { %v346_v9 = vxor.u32 2147483648, %v345_v5 }
 0x1bf   :  { %v347_v10 = vsel %vm264_vm0, %v346_v9, %v345_v5 }
 0x1c0   :  { %v350_v12 = vsel %vm263_vm1, %v1047_v52, %v347_v10 }
 0x1c1   :  { %839 = vcosq.f32 %v350_v12 }
 0x1c2   :  { %841 = vsinq.f32 %v350_v12 }
 0x1cb   :  { %v840_v23 = vpop.eup %839 }
 0x1cc   :  { %v842_v28 = vpop.eup %841  ;;  %v361_v29 = vxor.u32 2147483648, %v840_v23 }
 0x1cd   :  { %v358_v33 = vxor.u32 2147483648, %v842_v28 }
 0x1ce   :  { %v362_v35 = vsel %vm360_vm2, %v361_v29, %v842_v28  ;;  %v466_v36 = vsel %vm464_vm3, %v361_v29, %v842_v28  ;;  %v590_v29 = vrot.slane %v472_v13, %v1087_v27 }
 0x1cf   :  { %v359_v37 = vsel %vm357_vm4, %v840_v23, %v358_v33  ;;  %v463_v38 = vsel %vm461_vm5, %v840_v23, %v358_v33  ;;  %v552_v23 = vrot.slane %v472_v13, %v1081_v25 }
 0x1d0   :  { %v363_v39 = vsel %vm356_vm6, %v359_v37, %v362_v35  ;;  %v467_v40 = vsel %vm460_vm7, %v463_v38, %v466_v36  ;;  %v562_v37 = vrot.slane %v472_v13, %v1084_v26 }
 0x1d1   :  { %v364_v3 = vsel %vm354_vm8, nan, %v363_v39  ;;  %v468_v42 = vsel %vm354_vm8, nan, %v467_v40 }
 0x1d2   :  { %v469_v45 = vmul.f32 -1.0, %v468_v42  ;;  %v470_v46 = vmul.f32 5.0000015e-10, %v468_v42  ;;  %539 = vrot.lane.b32.xlu1 %v364_v3, %s957_s2  ;;  %v478_v47 = vmul.f32 %v477_v19, %v364_v3  ;;  %v498_v48 = vmul.f32 %v482_v57, %v364_v3 }
 0x1d3   :  { %v508_v49 = vmul.f32 %v507_v24, %v364_v3  ;;  %v528_v50 = vmul.f32 %v512_v22, %v364_v3  ;;  %v537_v19 = vrot.slane %v472_v13, %v1023_v6  ;;  %v579_v57 = vrot.slane %v472_v13, %v1074_v18 }
 0x1d4   :  { %v484_v52 = vsub.f32 %v478_v47, %v483_v30  ;;  %v499_v53 = vadd.f32 %v498_v48, %v497_v31  ;;  %554 = vrot.lane.b32.xlu0 %v469_v45, %s957_s2  ;;  %v489_v54 = vmul.f32 %v488_v41, %v469_v45  ;;  %v500_v59 = vmul.f32 %v488_v41, %v470_v46 }
 0x1d5   :  { %v514_v56 = vsub.f32 %v508_v49, %v513_v34  ;;  %v529_v58 = vadd.f32 %v528_v50, %v527_v43  ;;  %v519_v60 = vmul.f32 %v518_v44, %v469_v45  ;;  %v530_v61 = vmul.f32 %v518_v44, %v470_v46 }
 0x1d6   :  { %564 = vrot.lane.b32.xlu1 %v470_v46, %s957_s2  ;;  %v495_v62 = vmul.f32 %v494_v51, %v470_v46  ;;  %v502_v63 = vmul.f32 %v494_v51, %v469_v45  ;;  %v490_v0 = vadd.f32 %v489_v54, %v484_v52  ;;  %v501_v1 = vadd.f32 %v500_v59, %v499_v53 }
 0x1d7   :  { %v525_v2 = vmul.f32 %v524_v55, %v470_v46  ;;  %v532_v4 = vmul.f32 %v524_v55, %v469_v45  ;;  %v520_v5 = vadd.f32 %v519_v60, %v514_v56  ;;  %v531_v8 = vadd.f32 %v530_v61, %v529_v58 }
 0x1d8   :  { %v496_v9 = vsub.f32 %v490_v0, %v495_v62  ;;  %v503_v10 = vadd.f32 %v502_v63, %v501_v1  ;;  %v585_v22 = vmul.f32 0.0, %v584_v16  ;;  %v569_v28 = vmul.f32 0.0, %v537_v19 }
 0x1d9   :  { %v1097_v11 = vsub.f32 %v520_v5, %v525_v2  ;;  %v1099_v12 = vadd.f32 %v532_v4, %v531_v8  ;;  %v1111_v34 = vrot.slane %v1105_v20, %v1068_v14  ;;  %v599_v38 = vmul.f32 0.0, %v579_v57 }
 0x1da   :  { %v596_v3 = vrot.slane %v472_v13, %v1090_v32  ;;  %v663_v42 = vrot.slane %v1105_v20, %v1074_v18  ;;  %v1119_v43 = vrot.slane %v1105_v20, %v1071_v17  ;;  %v633_v52 = vrot.slane %v1105_v20, %v1023_v6 }
 0x1db   :  { %v644_v18 = vrot.slane %v1105_v20, %v1081_v25  ;;  %v650_v58 = vrot.slane %v1105_v20, %v1084_v26 }
 0x244   :  { %v540_v24 = vpop.permute.xlu1 %539 }
 0x245   :  { %v542_v30 = vmul.f32 %v540_v24, %v537_v19  ;;  %v570_v31 = vmul.f32 %v546_v15, %v540_v24  ;;  %v580_v33 = vmul.f32 %v579_v57, %v540_v24  ;;  %v600_v35 = vmul.f32 %v584_v16, %v540_v24 }
 0x246   :  { %v555_v36 = vpop.permute.xlu0 %554  ;;  %v674_v24 = vrot.slane %v1105_v20, %v1087_v27 }
 0x247   :  { %v548_v39 = vsub.f32 %v542_v30, %v547_v21  ;;  %v586_v40 = vsub.f32 %v580_v33, %v585_v22  ;;  %v557_v41 = vmul.f32 %v555_v36, %v552_v23  ;;  %v571_v44 = vadd.f32 %v570_v31, %v569_v28 }
 0x248   :  { %v591_v14 = vmul.f32 %v590_v29, %v555_v36  ;;  %v565_v45 = vpop.permute.xlu1 %564  ;;  %v601_v51 = vadd.f32 %v600_v35, %v599_v38  ;;  %v574_v54 = vmul.f32 %v562_v37, %v555_v36  ;;  %v604_v56 = vmul.f32 %v596_v3, %v555_v36 }
 0x249   :  { %v558_v46 = vadd.f32 %v557_v41, %v548_v39  ;;  %v567_v47 = vmul.f32 %v565_v45, %v562_v37  ;;  %v572_v48 = vmul.f32 %v565_v45, %v552_v23  ;;  %v597_v49 = vmul.f32 %v596_v3, %v565_v45 }
 0x24a   :  { %v592_v50 = vadd.f32 %v591_v14, %v586_v40  ;;  %v602_v53 = vmul.f32 %v590_v29, %v565_v45  ;;  %v680_v31 = vrot.slane %v1105_v20, %v1090_v32 }
 0x24b   :  { %v568_v55 = vsub.f32 %v558_v46, %v567_v47  ;;  %v573_v17 = vadd.f32 %v572_v48, %v571_v44 }
 0x24c   :  { %v598_v59 = vsub.f32 %v592_v50, %v597_v49  ;;  %v603_v60 = vadd.f32 %v602_v53, %v601_v51 }
 0x24d   :  { %v575_v61 = vadd.f32 %v574_v54, %v573_v17  ;;  %v606_v62 = vmul.f32 %v568_v55, %v496_v9  ;;  %v609_v63 = vmul.f32 %v568_v55, %v503_v10  ;;  %v612_v0 = vmul.f32 %v568_v55, %v1097_v11 }
 0x24e   :  { %v605_v1 = vadd.f32 %v604_v56, %v603_v60  ;;  %v615_v6 = vmul.f32 %v568_v55, %v1099_v12  ;;  %v618_v2 = vmul.f32 %v598_v59, %v496_v9  ;;  %v621_v4 = vmul.f32 %v598_v59, %v503_v10 }
 0x24f   :  { %v607_v5 = vmul.f32 %v575_v61, %v503_v10  ;;  %v610_v25 = vmul.f32 %v575_v61, %v496_v9  ;;  %v613_v8 = vmul.f32 %v575_v61, %v1099_v12  ;;  %v616_v13 = vmul.f32 %v575_v61, %v1097_v11 }
 0x250   :  { %v619_v15 = vmul.f32 %v605_v1, %v503_v10  ;;  %v622_v26 = vmul.f32 %v605_v1, %v496_v9  ;;  %v624_v16 = vmul.f32 %v598_v59, %v1097_v11  ;;  %v625_v19 = vmul.f32 %v605_v1, %v1099_v12 }
 0x251   :  { %v608_v57 = vsub.f32 %v606_v62, %v607_v5  ;;  %v611_v21 = vadd.f32 %v610_v25, %v609_v63  ;;  %v614_v22 = vsub.f32 %v612_v0, %v613_v8  ;;  %v617_v23 = vadd.f32 %v616_v13, %v615_v6 }
 0x252   :  { %v620_v28 = vsub.f32 %v618_v2, %v619_v15  ;;  %v623_v29 = vadd.f32 %v622_v26, %v621_v4  ;;  %v626_v30 = vsub.f32 %v624_v16, %v625_v19  ;;  %v627_v10 = vmul.f32 %v598_v59, %v1099_v12 }
 0x253   :  { %v628_v9 = vmul.f32 %v605_v1, %v1097_v11  ;;  %v690_v33 = vmul.f32 %v608_v57, %v608_v57  ;;  %v691_v38 = vmul.f32 %v611_v21, %v611_v21  ;;  %v704_v41 = vmul.f32 %v614_v22, %v614_v22 }
 0x254   :  { %v634_v35 = vmul.f32 %v633_v52, %v620_v28  ;;  %v639_v36 = vmul.f32 %v1111_v34, %v623_v29  ;;  %v653_v37 = vmul.f32 %v633_v52, %v623_v29  ;;  %v654_v40 = vmul.f32 %v1111_v34, %v620_v28 }
 0x255   :  { %v629_v39 = vadd.f32 %v628_v9, %v627_v10  ;;  %v664_v27 = vmul.f32 %v663_v42, %v620_v28  ;;  %v645_v44 = vmul.f32 %v644_v18, %v626_v30  ;;  %v669_v14 = vmul.f32 %v1119_v43, %v623_v29 }
 0x256   :  { %v640_v3 = vsub.f32 %v634_v35, %v639_v36  ;;  %v683_v32 = vmul.f32 %v663_v42, %v623_v29  ;;  %v655_v20 = vadd.f32 %v654_v40, %v653_v37  ;;  %v658_v45 = vmul.f32 %v650_v58, %v626_v30 }
 0x257   :  { %v656_v12 = vmul.f32 %v644_v18, %v629_v39  ;;  %v675_v11 = vmul.f32 %v674_v24, %v626_v30  ;;  %v651_v47 = vmul.f32 %v650_v58, %v629_v39  ;;  %v670_v48 = vsub.f32 %v664_v27, %v669_v14 }
 0x258   :  { %v646_v46 = vadd.f32 %v645_v44, %v640_v3  ;;  %v684_v49 = vmul.f32 %v1119_v43, %v620_v28  ;;  %v681_v51 = vmul.f32 %v680_v31, %v629_v39  ;;  %v692_v52 = vadd.f32 %v691_v38, %v690_v33 }
 0x259   :  { %v657_v50 = vadd.f32 %v656_v12, %v655_v20  ;;  %v705_v34 = vmul.f32 %v617_v23, %v617_v23  ;;  %v676_v54 = vadd.f32 %v675_v11, %v670_v48  ;;  %v686_v17 = vmul.f32 %v674_v24, %v629_v39 }
 0x25a   :  { %v652_v53 = vsub.f32 %v646_v46, %v651_v47  ;;  %v685_v55 = vadd.f32 %v684_v49, %v683_v32  ;;  %v688_v18 = vmul.f32 %v680_v31, %v626_v30 }
 0x25b   :  { %v659_v56 = vadd.f32 %v658_v45, %v657_v50  ;;  %v706_v59 = vadd.f32 %v705_v34, %v704_v41  ;;  %v682_v42 = vsub.f32 %v676_v54, %v681_v51 }
 0x25c   :  { %v687_v60 = vadd.f32 %v686_v17, %v685_v55  ;;  %v693_v61 = vmul.f32 %v652_v53, %v652_v53 }
 0x25d   :  { %v695_v58 = vmul.f32 %v659_v56, %v659_v56  ;;  %v707_v0 = vmul.f32 %v682_v42, %v682_v42 }
 0x25e   :  { %v689_v62 = vadd.f32 %v688_v18, %v687_v60  ;;  %v694_v63 = vadd.f32 %v693_v61, %v692_v52 }
 0x25f   :  { %v708_v43 = vadd.f32 %v707_v0, %v706_v59 }
 0x260   :  { %v696_v1 = vadd.f32 %v695_v58, %v694_v63  ;;  %v709_v6 = vmul.f32 %v689_v62, %v689_v62 }
 0x262   :  { %v710_v2 = vadd.f32 %v709_v6, %v708_v43  ;;  %vm699_vm11 = vcmp.eq.f32.partialorder %v696_v1, inf  ;;  %v702_v19 = vand.u32 2147483648, %v696_v1  ;;  %vm701_vm13 = vcmp.eq.f32.partialorder %v696_v1, 0.0 }
 0x264   :  { %843 = vrsqrt.f32 %v710_v2  ;;  %vm713_vm9 = vcmp.eq.f32.partialorder %v710_v2, inf  ;;  %v716_v25 = vand.u32 2147483648, %v710_v2  ;;  %vm715_vm10 = vcmp.eq.f32.partialorder %v710_v2, 0.0 }
 0x265   :  { %845 = vrsqrt.f32 %v696_v1 }
 0x26e   :  { %v844_v4 = vpop.eup %843 }
 0x26f   :  { %v712_v5 = vmul.f32 %v844_v4, %v710_v2  ;;  %v846_v15 = vpop.eup %845 }
 0x270   :  { %v698_v26 = vmul.f32 %v846_v15, %v696_v1 }
 0x271   :  { %v714_v8 = vsel %vm713_vm9, %v710_v2, %v712_v5 }
 0x272   :  { %v717_v13 = vsel %vm715_vm10, %v716_v25, %v714_v8  ;;  %v700_v16 = vsel %vm699_vm11, %v696_v1, %v698_v26 }
 0x273   :  { %719 = vrot.lane.b32.xlu0 %v717_v13, %s942_s22  ;;  %v703_v21 = vsel %vm701_vm13, %v702_v19, %v700_v16 }
 0x2e5   :  { %v720_v57 = vpop.permute.xlu0 %719 }
 0x2e6   :  { %v723_v22 = vsel %vm722_vm12, %v703_v21, %v720_v57 }
 0x2e7   :  { %v725_v23 = vcombine.high %v723_v22, %v723_v22  ;;  %v732_v24 = vrot.slane %v723_v22, %v1026_v7 }
 0x2e9   :  { %v739_v28 = vrot.slane %v725_v23, %v1026_v7  ;;  %v740_v29 = vcombine.high %v732_v24, %v732_v24  ;;  %v748_v30 = vrot.slane %v732_v24, %v1026_v7 }
 0x2eb   :  { %v741_v31 = vcombine.high %v739_v28, %v739_v28  ;;  %v755_v10 = vrot.slane %v739_v28, %v1026_v7  ;;  %v762_v9 = vrot.slane %v740_v29, %v1026_v7  ;;  %v770_v33 = vcombine.high %v748_v30, %v748_v30  ;;  %779 = vst.msk [vmem:[#allocation10] sm:$0x1] %vm778_vm14, %v748_v30 }
 0x2ed   :  { %v769_v35 = vrot.slane %v741_v31, %v1026_v7  ;;  %v771_v36 = vcombine.high %v762_v9, %v762_v9  ;;  %780 = vst.msk [vmem:[#allocation10 + $0x1] sm:$0x1] %vm778_vm14, %v762_v9  ;;  %781 = vst.msk [vmem:[#allocation10 + $0x2] sm:$0x1] %vm778_vm14, %v770_v33 }
 0x2ee   :  { %783 = vst.msk [vmem:[#allocation10 + $0x4] sm:$0x1] %vm778_vm14, %v755_v10 }
 0x2ef   :  { %782 = vst.msk [vmem:[#allocation10 + $0x3] sm:$0x1] %vm778_vm14, %v771_v36  ;;  %784 = vst.msk [vmem:[#allocation10 + $0x5] sm:$0x1] %vm778_vm14, %v769_v35 }
 0x2f0   :  { %924 = shalt.err (!%p921_p0)
}
 0x2f1   :  { %s925_s30 = scalar_lea.hbm %s1174_s3, 96 }
 0x2f2   :  { %p926_p1 = scmp.ne.s32.totalorder %s1174_s3, %s925_s30  ;;  %p929_p2 = scmp.lt.u32.totalorder %s925_s30, %s1174_s3 }
 0x2f4   :  { %p931_p3 = pnand %p929_p2, %p926_p1 }
 0x2f6   :  { %934 = shalt.err (!%p931_p3)
}
 0x2f7   :  { %796 = dma.vmem_to_hbm [thread:$0]  %s791_s26, 96, %s1174_s3, [#allocation6], %s942_s22, %s942_s22, %s943_s23  }
 0x2f8   :  { %939 = dma.done.wait [#allocation6], 96  }
 0x2f9   :  { %940 = vsyncadd [#allocation6], 4294967200 }
 0x2fa   :  { %800 = vsyncpa [#allocation5], 1 }
 0x2fb   :  { %801 = vsyncpa [#allocation8], 1 }
 0x2fc   :  { %802 = vsyncpa [#allocation6], 1 }

</bundles_post_ra>
